<compile_context>
chip_gen: v7x
topology: tpu7x:2x2x1
jax: 0.10.0
libtpu: 0.0.40
codegen_flags: <defaults>
</compile_context>

<pallas_src>
import math

import jax
import jax.numpy as jnp
from jax.experimental import pallas as pl
from jax.experimental.pallas import tpu as pltpu


def _scaler_kernel(x_ref, m_ref, inv_ref, o_ref):
    # Elementwise hot path: (x - means) * inv_stds with row-broadcast (1, tw)
    # vectors.  Compute stays in f32 for parity with the f32 scaler buffers
    # (a bf16 fast path would be a tiny win here: the kernel is HBM-bound).
    x = x_ref[...].astype(jnp.float32)       # (tn, tw)
    m = m_ref[...]                           # (1, tw) -> broadcasts over rows
    inv = inv_ref[...]                       # (1, tw)
    o_ref[...] = ((x - m) * inv).astype(o_ref.dtype)


def _cdiv(a, b):
    return -(-a // b)


def _sublane_pack(dtype):
    # f32 -> 8 rows/vreg, bf16 -> 16, int8/fp8 -> 32
    return {4: 8, 2: 16, 1: 32}.get(jnp.dtype(dtype).itemsize, 8)


def _device_kind():
    try:
        return jax.devices()[0].device_kind.lower()
    except Exception:
        return ""


def _vmem_capacity_bytes():
    try:
        info = pltpu.get_tpu_info()
        v = getattr(info, "vmem_capacity_bytes", None)
        if v:
            return int(v)
    except Exception:
        pass
    # v7x has 64 MiB VMEM per TensorCore; v5e/v6e have 128 MiB.
    return (64 if "7" in _device_kind() else 128) * 1024 * 1024


def _default_tile_bytes():
    # v7x: ~2.2-2.5x the HBM bandwidth of v6e, so the ~0.35us per-grid-step
    # overhead is a larger fraction of each step -> bigger tiles.  v5e/v6e are
    # already at the measured roofline plateau at ~2 MiB.
    if "7" in _device_kind():
        return 4 * 1024 * 1024
    return 2 * 1024 * 1024


def _choose_tiles(R, W, dtype, tile_bytes, target_row_blocks=8):
    pack = _sublane_pack(dtype)
    itemsize = jnp.dtype(dtype).itemsize

    # Lane tile: keep the whole row when it fits the budget with >= `pack`
    # rows (drops the lane grid axis; means/inv fetched once; contiguous row
    # DMAs).  Otherwise pick a multiple-of-128 divisor of W (no partial
    # trailing lane block).  If W is not a multiple of 128 the block last dim
    # must equal the full array dim.
    if W % 128 != 0 or W * pack * itemsize <= tile_bytes:
        tw = W
    else:
        tw = 0
        max_lanes = max(128, tile_bytes // (pack * itemsize) // 128 * 128)
        for cand in range(min(W, max_lanes), 127, -128):
            if W % cand == 0:
                tw = cand
                break
        if tw == 0:
            tw = min(W, 2048)

    # Row tile: as big as the byte budget allows, multiple of the sublane
    # packing, but capped so there are ~target_row_blocks row blocks when R is
    # large enough (both v7x TCs get work; DMA/compute/DMA stay overlapped).
    budget_rows = max(pack, (tile_bytes // itemsize) // max(tw, 1))
    tn = max(pack, budget_rows // pack * pack)
    cap = max(pack, (_cdiv(R, target_row_blocks) + pack - 1) // pack * pack)
    tn = min(tn, cap)
    return tn, tw


def _vmem_limit_bytes(tn, tw, dtype):
    itemsize = jnp.dtype(dtype).itemsize
    tw_pad = _cdiv(tw, 128) * 128
    tile = tn * tw_pad * itemsize
    rows = 2 * tw_pad * 4                       # means + inv rows (f32)
    # double-buffered input tile + double-buffered output tile + rows + headroom
    need = 2 * tile + 2 * tile + 2 * rows + (4 << 20)
    cap = max(_vmem_capacity_bytes() * 3 // 4, 8 << 20)
    return int(min(max(need, 8 << 20), cap))


def _scaler_call(x2d, m_row, inv_row, tn, tw, vmem_limit):
    R, W = x2d.shape
    itemsize = jnp.dtype(x2d.dtype).itemsize
    cost = pl.CostEstimate(
        flops=2 * R * W,
        transcendentals=0,
        bytes_accessed=2 * R * W * itemsize + 2 * W * 4,
    )

    if tw == W:
        # 1-D grid over rows; means/inv block index is constant -> resident.
        grid = (_cdiv(R, tn),)
        in_specs = [
            pl.BlockSpec((tn, W), lambda i: (i, 0)),   # X tile
            pl.BlockSpec((1, W), lambda i: (0, 0)),    # means row
            pl.BlockSpec((1, W), lambda i: (0, 0)),    # inv_stds row
        ]
        out_specs = pl.BlockSpec((tn, W), lambda i: (i, 0))
        dims = ("parallel",)
    else:
        # Lane axis outermost so the (1, tw) means/inv blocks stay resident
        # across the inner row loop (fetched once per lane stripe).
        grid = (_cdiv(W, tw), _cdiv(R, tn))
        in_specs = [
            pl.BlockSpec((tn, tw), lambda j, i: (i, j)),
            pl.BlockSpec((1, tw), lambda j, i: (0, j)),
            pl.BlockSpec((1, tw), lambda j, i: (0, j)),
        ]
        out_specs = pl.BlockSpec((tn, tw), lambda j, i: (i, j))
        dims = ("parallel", "parallel")

    return pl.pallas_call(
        _scaler_kernel,
        out_shape=jax.ShapeDtypeStruct((R, W), x2d.dtype),
        grid_spec=pltpu.PrefetchScalarGridSpec(
            num_scalar_prefetch=0,
            grid=grid,
            in_specs=in_specs,
            out_specs=out_specs,
        ),
        compiler_params=pltpu.CompilerParams(
            dimension_semantics=dims,
            vmem_limit_bytes=vmem_limit,
        ),
        cost_estimate=cost,
    )(x2d, m_row, inv_row)


def torch_scaler_transform(x, means, stds, *, tile_bytes=None):
    """Pallas implementation of TorchScaler.forward (transform)."""
    n, d = x.shape

    # Sanitize stds (guard zeros / non-finite, matching TorchScaler.fit's
    # stds[stds == 0] = 1 behaviour) and hoist the reciprocal: one O(D) op in
    # the wrapper instead of a per-element divide in the hot loop.
    # TODO(synk): a literal torch transform() with unsanitized zero stds would
    # produce inf/NaN; this guard mirrors fit()'s semantics instead.
    stds32 = stds.astype(jnp.float32).reshape(1, d)
    stds32 = jnp.where((stds32 == 0) | ~jnp.isfinite(stds32), 1.0, stds32)
    means32 = means.astype(jnp.float32).reshape(1, d)
    inv32 = 1.0 / stds32

    if tile_bytes is None:
        tile_bytes = _default_tile_bytes()

    # --- choose a lane-dense (R, W) view of X WITHOUT any HBM copies ---
    if d % 128 == 0:
        x2d, m_row, i_row = x, means32, inv32
        out_shape = None
    else:
        reps = 128 // math.gcd(d, 128)          # rows folded per lane-dense row
        if n % reps == 0:
            L = reps * d                        # lcm(d, 128): multiple of 128
            x2d = x.reshape(n // reps, L)       # contiguous reshape: free bitcast
            m_row = jnp.tile(means32, (1, reps))
            i_row = jnp.tile(inv32, (1, reps))
            out_shape = (n, d)
        else:
            # Remainder rows exist: keep the original layout (full-D blocks,
            # masked stores on the narrow lane case) rather than paying pad /
            # slice / concat copies of X and the output.
            x2d, m_row, i_row = x, means32, inv32
            out_shape = None

    R, W = x2d.shape
    tn, tw = _choose_tiles(R, W, x2d.dtype, tile_bytes)
    vmem_limit = _vmem_limit_bytes(tn, tw, x2d.dtype)

    out2d = _scaler_call(x2d, m_row, i_row, tn, tw, vmem_limit)
    return out2d if out_shape is None else out2d.reshape(out_shape)


def fit(x):
    """Plain-JAX glue mirroring TorchScaler.fit (tiny reductions, not the hot path)."""
    means = x.mean(axis=0)
    stds = x.std(axis=0, ddof=1)               # torch.Tensor.std default is unbiased
    stds = jnp.where(stds == 0, 1.0, stds)
    return means, stds


if __name__ == "__main__":
    key = jax.random.PRNGKey(0)

    # 1) D % 128 != 0 with N % reps == 0  -> free-reshape lane-dense path.
    N, D = 16, 32
    x = jax.random.normal(key, (N, D), dtype=jnp.float32) * 3.0 + 1.5
    means, stds = fit(x)
    out = jax.block_until_ready(torch_scaler_transform(x, means, stds))
    ref = (x - means[None, :]) / stds[None, :]
    assert out.shape == (N, D) and out.dtype == x.dtype
    assert jnp.allclose(out, ref, atol=1e-5, rtol=1e-5)

    # 2) __init__-style buffers (zeros/ones) -> identity transform.
    out_id = jax.block_until_ready(
        torch_scaler_transform(x, jnp.zeros((D,), jnp.float32), jnp.ones((D,), jnp.float32))
    )
    assert jnp.allclose(out_id, x, atol=1e-6)

    # 3) D % 128 == 0 path, multi-row-block grid via a small tile budget.
    k2 = jax.random.PRNGKey(1)
    N2, D2 = 200, 256
    x2 = jax.random.normal(k2, (N2, D2), dtype=jnp.float32) * 2.0 - 0.5
    m2, s2 = fit(x2)
    out2 = jax.block_until_ready(torch_scaler_transform(x2, m2, s2, tile_bytes=64 * 1024))
    ref2 = (x2 - m2[None, :]) / s2[None, :]
    assert jnp.allclose(out2, ref2, atol=1e-5, rtol=1e-5)

    # 4) Zero-std guard in the transform path itself.
    s_bad = s2.at[0].set(0.0)
    out3 = jax.block_until_ready(torch_scaler_transform(x2, m2, s_bad))
    assert bool(jnp.all(jnp.isfinite(out3)))

    # 5) Remainder path (N % reps != 0): original-layout fallback, no copies.
    k3 = jax.random.PRNGKey(2)
    N3, D3 = 13, 32
    x3 = jax.random.normal(k3, (N3, D3), dtype=jnp.float32) + 0.25
    m3, s3 = fit(x3)
    out4 = jax.block_until_ready(torch_scaler_transform(x3, m3, s3))
    ref4 = (x3 - m3[None, :]) / s3[None, :]
    assert jnp.allclose(out4, ref4, atol=1e-5, rtol=1e-5)

    # 6) Wide rows + tiny budget -> 2-D grid with the lane axis outermost.
    k4 = jax.random.PRNGKey(3)
    N4, D4 = 64, 1024
    x4 = jax.random.normal(k4, (N4, D4), dtype=jnp.float32) * 1.7 - 0.3
    m4, s4 = fit(x4)
    out5 = jax.block_until_ready(torch_scaler_transform(x4, m4, s4, tile_bytes=16 * 1024))
    ref5 = (x4 - m4[None, :]) / s4[None, :]
    assert jnp.allclose(out5, ref5, atol=1e-5, rtol=1e-5)

    print("KERNEL_OK")
</pallas_src>

<mosaic_0001>
module attributes {stable_mosaic.version = 11 : i64} {
  func.func @_scaler_kernel(%arg0: i32, %arg1: memref<8x128xf32, #tpu.memory_space<vmem>>, %arg2: memref<1x128xf32, #tpu.memory_space<vmem>>, %arg3: memref<1x128xf32, #tpu.memory_space<vmem>>, %arg4: memref<8x128xf32, #tpu.memory_space<vmem>>) attributes {dimension_semantics = [#tpu.dimension_semantics<parallel>], iteration_bounds = array<i64: 1>, scalar_prefetch = 0 : i64, scratch_operands = 0 : i64, tpu.core_type = #tpu.core_type<tc>, window_params = [{transform_indices = @transform_0, window_bounds = array<i64: 8, 128>}, {pipeline_mode = #tpu.pipeline_mode<synchronous>, transform_indices = @transform_1, window_bounds = array<i64: 1, 128>}, {pipeline_mode = #tpu.pipeline_mode<synchronous>, transform_indices = @transform_2, window_bounds = array<i64: 1, 128>}, {transform_indices = @transform_3, window_bounds = array<i64: 8, 128>}]} {
    %c0 = arith.constant 0 : index
    %c0_0 = arith.constant 0 : index
    %0 = vector.load %arg1[%c0, %c0_0] : memref<8x128xf32, #tpu.memory_space<vmem>>, vector<8x128xf32>
    %c0_1 = arith.constant 0 : index
    %c0_2 = arith.constant 0 : index
    %1 = vector.load %arg2[%c0_1, %c0_2] : memref<1x128xf32, #tpu.memory_space<vmem>>, vector<1x128xf32>
    %c0_3 = arith.constant 0 : index
    %c0_4 = arith.constant 0 : index
    %2 = vector.load %arg3[%c0_3, %c0_4] : memref<1x128xf32, #tpu.memory_space<vmem>>, vector<1x128xf32>
    %3 = vector.broadcast %1 : vector<1x128xf32> to vector<8x128xf32>
    %4 = arith.subf %0, %3 : vector<8x128xf32>
    %5 = vector.broadcast %2 : vector<1x128xf32> to vector<8x128xf32>
    %6 = arith.mulf %4, %5 : vector<8x128xf32>
    %c0_5 = arith.constant 0 : index
    %c0_6 = arith.constant 0 : index
    %7 = vector.load %arg4[%c0_5, %c0_6] : memref<8x128xf32, #tpu.memory_space<vmem>>, vector<8x128xf32>
    tpu.vector_store %arg4[%c0_5, %c0_6], %6 {strides = array<i32>} : memref<8x128xf32, #tpu.memory_space<vmem>>, vector<8x128xf32>,
    return
  }
  func.func @transform_0(%arg0: i32) -> (i32, i32) {
    %c0_i32 = arith.constant 0 : i32
    %c0_i32_0 = arith.constant 0 : i32
    return %arg0, %c0_i32 : i32, i32
  }
  func.func @transform_1(%arg0: i32) -> (i32, i32) {
    %c0_i32 = arith.constant 0 : i32
    %c0_i32_0 = arith.constant 0 : i32
    %c0_i32_1 = arith.constant 0 : i32
    return %c0_i32, %c0_i32_0 : i32, i32
  }
  func.func @transform_2(%arg0: i32) -> (i32, i32) {
    %c0_i32 = arith.constant 0 : i32
    %c0_i32_0 = arith.constant 0 : i32
    %c0_i32_1 = arith.constant 0 : i32
    return %c0_i32, %c0_i32_0 : i32, i32
  }
  func.func @transform_3(%arg0: i32) -> (i32, i32) {
    %c0_i32 = arith.constant 0 : i32
    %c0_i32_0 = arith.constant 0 : i32
    return %arg0, %c0_i32 : i32, i32
  }
}

</mosaic_0001>

<bundles_post_ra>
// kernel: tpu_custom_call.1
= control target key start
LH: loop header
LB: loop body
LE: loop exit
PB: predicated region body
PF: predicated region fallthrough
CT: control target
= control target key end

     0   :  { %8 = vsyncpa [#allocation3], 0  ;;  %s178_s0 = inlined_call_operand.hbm [shape: f32[4,128], index: 0, kind: input, shape index: {}]   ;;  %s179_s1 = inlined_call_operand.vmem [shape: f32[1,128], index: 1, kind: input, shape index: {}]   ;;  %s180_s2 = inlined_call_operand.vmem [shape: f32[1,128], index: 2, kind: input, shape index: {}]   ;;  %s181_s3 = inlined_call_operand.hbm [shape: f32[4,128], index: 3, kind: output, shape index: {}]  }
   0x1   :  { %9 = vsyncpa [#allocation4], 0 }
   0x2   :  { %14 = vsyncadd [#allocation3], 64  ;;  %s118_s12 = smov [#allocation2]   ;;  %s70_s16 = scalar_lea.hbm %s178_s0, 64 }
   0x3   :  { %s15_s13 = sshll.u32 %s118_s12, 4  ;;  %p71_p0 = scmp.ne.s32.totalorder %s178_s0, %s70_s16  ;;  %s16_s13 = int_to_ptr.vmem [resolvable:$true] %s15_s13 }
   0x4   :  { %p74_p1 = scmp.lt.u32.totalorder %s70_s16, %s178_s0 }
   0x6   :  { %p76_p2 = pnand %p74_p1, %p71_p0 }
   0x8   :  { %79 = shalt.err (!%p76_p2)
}
   0x9   :  { %s80_s21 = scalar_lea.vmem %s16_s13, 64  ;;  %s84_s22 = scalar_lea.vmem %s16_s13, 128 }
   0xa   :  { %p81_p3 = scmp.ne.s32.totalorder %s16_s13, %s80_s21  ;;  %p85_p4 = scmp.lt.s32.totalorder %s16_s13, %s16_s13 }
   0xb   :  { %p86_p5 = scmp.lt.s32.totalorder %s84_s22, %s80_s21 }
   0xd   :  { %p87_p6 = por %p86_p5, %p85_p4 }
   0xf   :  { %p88_p7 = pnand %p87_p6, %p81_p3 }
  0x11   :  { %91 = shalt.err (!%p88_p7)
}
  0x12   :  { %s119_s23 = smov 64   ;;  %s120_s24 = smov 4  }
  0x13   :  { %21 = dma.hbm_to_vmem [thread:$0]  %s178_s0, 64, %s16_s13, [#allocation3], %s119_s23, %s119_s23, %s120_s24  }
  0x14   :  { %114 = dma.done.wait [#allocation3], 128  }
  0x15   :  { %115 = vsyncadd [#allocation3], 4294967168  ;;  %v29_v0 = vld [vmem:[#allocation2] sm:$0xff] }
  0x16   :  { %v64_v1 = vld [vmem:[%s179_s1] ss:$0 sm:$0xff] }
  0x17   :  { %v65_v2 = vld [vmem:[%s180_s2] ss:$0 sm:$0xff]  ;;  %v38_v3 = vsub.f32 %v29_v0, %v64_v1 }
  0x19   :  { %v45_v4 = vmul.f32 %v65_v2, %v38_v3 }
  0x1b   :  { %46 = vst [vmem:[#allocation5] sm:$0xff] %v45_v4 }
  0x1c   :  { %51 = vsyncadd [#allocation4], 64  ;;  %s121_s4 = smov [#allocation5]  }
  0x1d   :  { %s52_s5 = sshll.u32 %s121_s4, 4  ;;  %s53_s5 = int_to_ptr.vmem [resolvable:$true] %s52_s5 }
  0x1e   :  { %s92_s6 = scalar_lea.vmem %s53_s5, 64  ;;  %s96_s0 = scalar_lea.vmem %s53_s5, 128 }
  0x1f   :  { %p93_p8 = scmp.ne.s32.totalorder %s53_s5, %s92_s6  ;;  %p97_p9 = scmp.lt.s32.totalorder %s53_s5, %s53_s5 }
  0x20   :  { %p98_p10 = scmp.lt.s32.totalorder %s96_s0, %s92_s6 }
  0x22   :  { %p99_p11 = por %p98_p10, %p97_p9 }
  0x24   :  { %p100_p12 = pnand %p99_p11, %p93_p8 }
  0x26   :  { %103 = shalt.err (!%p100_p12)
}
  0x27   :  { %s104_s8 = scalar_lea.hbm %s181_s3, 64 }
  0x28   :  { %p105_p13 = scmp.ne.s32.totalorder %s181_s3, %s104_s8  ;;  %p108_p0 = scmp.lt.u32.totalorder %s104_s8, %s181_s3 }
  0x2a   :  { %p110_p1 = pnand %p108_p0, %p105_p13 }
  0x2c   :  { %113 = shalt.err (!%p110_p1)
}
  0x2d   :  { %58 = dma.vmem_to_hbm [thread:$0]  %s53_s5, 64, %s181_s3, [#allocation4], %s119_s23, %s119_s23, %s120_s24  }
  0x2e   :  { %116 = dma.done.wait [#allocation4], 128  }
  0x2f   :  { %117 = vsyncadd [#allocation4], 4294967168 }
  0x30   :  { %62 = vsyncpa [#allocation3], 1 }
  0x31   :  { %63 = vsyncpa [#allocation4], 1 }

</bundles_post_ra>
